<compile_context>
chip_gen: v7x
topology: tpu7x:2x2x1
jax: 0.10.0
libtpu: 0.0.40
codegen_flags: <defaults>
</compile_context>

<pallas_src>
import functools

import jax
import jax.numpy as jnp
from jax import lax
from jax.experimental import pallas as pl
from jax.experimental.pallas import tpu as pltpu


def _round_up(v, m):
    return (v + m - 1) // m * m


@functools.lru_cache(maxsize=None)
def _vmem_limit_bytes():
    """Generation-aware VMEM budget: ~75% of physical, with headroom caps."""
    try:
        cap = int(pltpu.get_tpu_info().vmem_capacity_bytes)
    except Exception:
        cap = 64 * 1024 * 1024            # conservative fallback (v7x physical)
    return max(32 * 1024 * 1024, min(cap * 3 // 4, 100 * 1024 * 1024))


# ----------------------------- Pallas kernels ------------------------------ #

def _pw_kernel(x_ref, w_ref, scale_ref, shift_ref, o_ref, *, relu6):
    """Fused 1x1x1 conv (bf16 MXU matmul over channels) + folded BN (+ReLU6)."""
    y = jnp.dot(x_ref[...].astype(jnp.bfloat16), w_ref[...],
                preferred_element_type=jnp.float32)
    y = y * scale_ref[...] + shift_ref[...]
    if relu6:
        y = jnp.clip(y, 0.0, 6.0)
    o_ref[...] = y.astype(o_ref.dtype)


def _pw_res_kernel(x_ref, w_ref, scale_ref, shift_ref, res_ref, o_ref):
    """Fused 1x1x1 conv + folded BN + residual add (use_res_connect path)."""
    y = jnp.dot(x_ref[...].astype(jnp.bfloat16), w_ref[...],
                preferred_element_type=jnp.float32)
    y = y * scale_ref[...] + shift_ref[...]
    y = y + res_ref[...].astype(jnp.float32)
    o_ref[...] = y.astype(o_ref.dtype)


def _dw_kernel(x_hbm, w_ref, scale_ref, shift_ref, o_ref, ring, sem,
               *, n_doff, ring_len, Dq, sd, sh, sw, Ho, Wo, C):
    """Depthwise 3x3x3 conv + folded BN + ReLU6 for ONE output D-slice.

    x_hbm : (N*Dq, P, Hq, Wq*C) bf16 phase-split padded input in HBM (ANY).
    ring  : (ring_len, P, Hq, Wq*C) bf16 VMEM rolling window over padded D —
            each padded-D slice is DMA'd from HBM exactly once per (n).
    Output block: (Ho, Wo*C) — lane-dense store; accumulation in f32.
    """
    n = pl.program_id(0)
    do = pl.program_id(1)
    n_do = pl.num_programs(1)

    def dma(d_src, slot):
        return pltpu.make_async_copy(x_hbm.at[n * Dq + d_src],
                                     ring.at[slot], sem.at[slot])

    # ---- rolling-window DMA (prefetch depth 1) ----------------------------
    @pl.when(do == 0)
    def _():                                   # prime the window for this n
        for k in range(n_doff):
            dma(k, k).start()
        for k in range(n_doff):
            dma(k, k).wait()

    @pl.when(do > 0)
    def _():                                   # newest slice of the window
        dma(do + n_doff - 1, (do + n_doff - 1) % ring_len).wait()

    @pl.when(do + 1 < n_do)
    def _():                                   # prefetch next step's slice
        dma(do + n_doff, (do + n_doff) % ring_len).start()

    # ---- 27-tap depthwise conv, stride realized via the phase split --------
    WoC = Wo * C
    acc = jnp.zeros((Ho, WoC), jnp.float32)
    for kd in range(3):
        slot = (do + kd // sd) % ring_len
        for kh in range(3):
            for kw in range(3):
                tap = (kd * 3 + kh) * 3 + kw
                phase = (kd % sd) * (sh * sw) + (kh % sh) * sw + (kw % sw)
                oh, ow = kh // sh, kw // sw
                xk = ring[slot, phase, oh:oh + Ho, ow * C:(ow + Wo) * C]
                acc = acc + xk.astype(jnp.float32) * w_ref[tap, :]
    y = acc * scale_ref[0] + shift_ref[0]
    y = jnp.clip(y, 0.0, 6.0)
    o_ref[...] = y.astype(o_ref.dtype)


# ------------------------------ kernel wrappers ----------------------------- #

def _choose_tm(M, cin, cout, target_bytes=4 << 20):
    """Byte-targeted row tile for the 1x1 GEMM (>=512 rows when M allows)."""
    rows = target_bytes // (4 * (cin + cout))
    tm = max(512, min(int(rows), 8192))
    tm = max(8, (tm // 8) * 8)
    return min(tm, _round_up(M, 8))


def pointwise_conv_bn(x2d, w, scale, shift, *, relu6=False, residual=None,
                      out_dtype=jnp.float32):
    """x2d: (M, Cin) of flattened N*D*H*W positions; w: (Cin, Cout) f32."""
    M, cin = x2d.shape
    cout = w.shape[1]
    tm = _choose_tm(M, cin, cout)
    Mp = _round_up(M, tm)
    if Mp != M:
        # TODO(synk): mask the ragged M tail in-kernel instead of HBM pad+slice.
        x2d = jnp.pad(x2d, ((0, Mp - M), (0, 0)))
        if residual is not None:
            residual = jnp.pad(residual, ((0, Mp - M), (0, 0)))
    grid = (Mp // tm,)

    wb = w.astype(jnp.bfloat16)                       # full-rate MXU operand
    scale2 = scale.reshape(1, cout).astype(jnp.float32)
    shift2 = shift.reshape(1, cout).astype(jnp.float32)

    x_spec = pl.BlockSpec((tm, cin), lambda i: (i, 0))
    w_spec = pl.BlockSpec((cin, cout), lambda i: (0, 0))
    s_spec = pl.BlockSpec((1, cout), lambda i: (0, 0))
    o_spec = pl.BlockSpec((tm, cout), lambda i: (i, 0))
    out_shape = jax.ShapeDtypeStruct((Mp, cout), out_dtype)
    cparams = pltpu.CompilerParams(dimension_semantics=("parallel",),
                                   vmem_limit_bytes=_vmem_limit_bytes())

    if residual is None:
        out = pl.pallas_call(
            functools.partial(_pw_kernel, relu6=relu6),
            out_shape=out_shape, grid=grid,
            in_specs=[x_spec, w_spec, s_spec, s_spec], out_specs=o_spec,
            compiler_params=cparams,
        )(x2d, wb, scale2, shift2)
    else:
        r_spec = pl.BlockSpec((tm, cout), lambda i: (i, 0))
        out = pl.pallas_call(
            _pw_res_kernel,
            out_shape=out_shape, grid=grid,
            in_specs=[x_spec, w_spec, s_spec, s_spec, r_spec], out_specs=o_spec,
            compiler_params=cparams,
        )(x2d, wb, scale2, shift2, residual)
    return out[:M] if Mp != M else out


def depthwise_conv_bn_relu6(x, w_dw, scale, shift, stride):
    """x: (N, D, H, W, C); w_dw: (3,3,3,C); stride (sd,sh,sw) in {1,2}.

    pad-1 (+ phase-split only when strided) once in the wrapper, stored bf16;
    one grid step per (n, D-out slice) with a manual rolling-window DMA over
    padded D, lane-dense (Wo*C) compute/stores, f32 accumulation in-kernel.
    Returns (N, Do, Ho, Wo, C) bfloat16.
    """
    N, D, H, W, C = x.shape
    sd, sh, sw = stride
    Do = (D - 1) // sd + 1
    Ho = (H - 1) // sh + 1
    Wo = (W - 1) // sw + 1
    Dq = -(-(D + 2) // sd)
    Hq = -(-(H + 2) // sh)
    Wq = -(-(W + 2) // sw)
    P = sd * sh * sw

    xb = x.astype(jnp.bfloat16)                       # bf16 storage only
    xp = jnp.pad(xb, ((0, 0),
                      (1, Dq * sd - D - 1),
                      (1, Hq * sh - H - 1),
                      (1, Wq * sw - W - 1),
                      (0, 0)))
    if P == 1:
        # stride (1,1,1): phase split is the identity — free reshapes only.
        xs = xp.reshape(N * Dq, 1, Hq, Wq * C)
    else:
        xs = xp.reshape(N, Dq, sd, Hq, sh, Wq, sw, C)
        xs = xs.transpose(0, 1, 2, 4, 6, 3, 5, 7).reshape(N * Dq, P, Hq, Wq * C)

    WoC = Wo * C
    # Per-tap weights / BN broadcast across the flattened (w, c) lane axis.
    w_flat = jnp.tile(w_dw.reshape(27, C).astype(jnp.float32), (1, Wo))
    sc_flat = jnp.tile(scale.reshape(1, C).astype(jnp.float32), (1, Wo))
    sh_flat = jnp.tile(shift.reshape(1, C).astype(jnp.float32), (1, Wo))

    n_doff = 1 + 2 // sd            # padded-D window: 3 (stride 1) / 2 (stride 2)
    ring_len = n_doff + 1           # +1 slot => prefetch depth 1

    kern = functools.partial(_dw_kernel, n_doff=n_doff, ring_len=ring_len,
                             Dq=Dq, sd=sd, sh=sh, sw=sw, Ho=Ho, Wo=Wo, C=C)

    out = pl.pallas_call(
        kern,
        out_shape=jax.ShapeDtypeStruct((N, Do, Ho, WoC), jnp.bfloat16),
        grid=(N, Do),
        in_specs=[pl.BlockSpec(memory_space=pl.ANY),     # manual rolling-window DMA
                  pl.BlockSpec((27, WoC), lambda n, do: (0, 0)),
                  pl.BlockSpec((1, WoC), lambda n, do: (0, 0)),
                  pl.BlockSpec((1, WoC), lambda n, do: (0, 0))],
        out_specs=pl.BlockSpec((pl.Squeezed(), pl.Squeezed(), Ho, WoC),
                               lambda n, do: (n, do, 0, 0)),
        scratch_shapes=[pltpu.VMEM((ring_len, P, Hq, Wq * C), jnp.bfloat16),
                        pltpu.SemaphoreType.DMA((ring_len,))],
        compiler_params=pltpu.CompilerParams(
            dimension_semantics=("parallel", "arbitrary"),
            vmem_limit_bytes=_vmem_limit_bytes()),
    )(xs, w_flat, sc_flat, sh_flat)
    return out.reshape(N, Do, Ho, Wo, C)


# --------------------------- InvertedResidual module ------------------------ #

def inverted_residual(x_ncdhw, params, stride, expand_ratio):
    """Forward pass of the PyTorch InvertedResidual block (inference).
    x_ncdhw: (N, C, D, H, W) float32 (PyTorch layout).  Returns NCDHW f32."""
    x = jnp.transpose(x_ncdhw, (0, 2, 3, 4, 1))          # -> NDHWC
    N, D, H, W, cin = x.shape
    hidden = params["w_dw"].shape[-1]
    oup = params["w_proj"].shape[-1]
    use_res = (tuple(stride) == (1, 1, 1)) and (cin == oup)

    y = x
    if expand_ratio != 1:
        y = pointwise_conv_bn(y.reshape(-1, cin), params["w_exp"],
                              params["scale1"], params["shift1"],
                              relu6=True, out_dtype=jnp.bfloat16)
        y = y.reshape(N, D, H, W, hidden)

    y = depthwise_conv_bn_relu6(y, params["w_dw"], params["scale2"],
                                params["shift2"], stride)   # bf16 in/out
    No, Do, Ho, Wo = y.shape[:4]

    residual = x.reshape(-1, cin) if use_res else None
    y = pointwise_conv_bn(y.reshape(-1, hidden), params["w_proj"],
                          params["scale3"], params["shift3"],
                          relu6=False, residual=residual, out_dtype=jnp.float32)
    y = y.reshape(No, Do, Ho, Wo, oup)
    return jnp.transpose(y, (0, 4, 1, 2, 3))              # -> NCDHW


# --------------------------- parameters & reference ------------------------- #

def fold_bn(gamma, beta, mean, var, eps=1e-5):
    scale = gamma / jnp.sqrt(var + eps)
    shift = beta - mean * scale
    return scale.astype(jnp.float32), shift.astype(jnp.float32)


def init_params(key, inp, oup, expand_ratio):
    hidden = int(round(inp * expand_ratio))
    ks = iter(jax.random.split(key, 16))
    p = {}

    def bn(c):
        gamma = jax.random.uniform(next(ks), (c,), minval=0.5, maxval=1.5)
        beta = 0.1 * jax.random.normal(next(ks), (c,))
        mean = 0.1 * jax.random.normal(next(ks), (c,))
        var = jax.random.uniform(next(ks), (c,), minval=0.5, maxval=1.5)
        return fold_bn(gamma, beta, mean, var)

    if expand_ratio != 1:
        p["w_exp"] = 0.2 * jax.random.normal(next(ks), (inp, hidden), jnp.float32)
        p["scale1"], p["shift1"] = bn(hidden)
    p["w_dw"] = 0.2 * jax.random.normal(next(ks), (3, 3, 3, hidden), jnp.float32)
    p["scale2"], p["shift2"] = bn(hidden)
    p["w_proj"] = 0.2 * jax.random.normal(next(ks), (hidden, oup), jnp.float32)
    p["scale3"], p["shift3"] = bn(oup)
    return p


def ref_inverted_residual(x_ncdhw, p, stride, expand_ratio):
    """Pure-JAX reference (lax.conv_general_dilated, f32 HIGHEST precision)."""
    dn = ("NDHWC", "DHWIO", "NDHWC")
    prec = lax.Precision.HIGHEST
    x = jnp.transpose(x_ncdhw, (0, 2, 3, 4, 1))
    y = x
    if expand_ratio != 1:
        y = lax.conv_general_dilated(y, p["w_exp"][None, None, None], (1, 1, 1),
                                     "VALID", dimension_numbers=dn, precision=prec)
        y = jnp.clip(y * p["scale1"] + p["shift1"], 0.0, 6.0)
    C = y.shape[-1]
    y = lax.conv_general_dilated(y, p["w_dw"].reshape(3, 3, 3, 1, C), stride,
                                 ((1, 1), (1, 1), (1, 1)), dimension_numbers=dn,
                                 feature_group_count=C, precision=prec)
    y = jnp.clip(y * p["scale2"] + p["shift2"], 0.0, 6.0)
    y = lax.conv_general_dilated(y, p["w_proj"][None, None, None], (1, 1, 1),
                                 "VALID", dimension_numbers=dn, precision=prec)
    y = y * p["scale3"] + p["shift3"]
    if tuple(stride) == (1, 1, 1) and x.shape[-1] == y.shape[-1]:
        y = x + y
    return jnp.transpose(y, (0, 4, 1, 2, 3))


# ----------------------------------- main ----------------------------------- #

if __name__ == "__main__":
    key = jax.random.PRNGKey(0)
    N, D, H, W = 2, 4, 8, 8
    cases = [
        # (inp, oup, stride, expand_ratio)
        (8, 8, (1, 1, 1), 4),    # expansion + residual connection
        (8, 16, (2, 2, 2), 4),   # strided, no residual (stride applied in-kernel)
        (8, 8, (1, 1, 1), 1),    # expand_ratio == 1 branch (no expansion conv)
    ]
    for i, (inp, oup, stride, er) in enumerate(cases):
        kx, kp, key = jax.random.split(key, 3)
        x = jax.random.normal(kx, (N, inp, D, H, W), jnp.float32)   # NCDHW like torch
        params = init_params(kp, inp, oup, er)

        out = jax.block_until_ready(inverted_residual(x, params, stride, er))
        ref = jax.block_until_ready(ref_inverted_residual(x, params, stride, er))

        assert out.shape == ref.shape and out.dtype == ref.dtype, (i, out.shape, ref.shape)
        # Intermediates are deliberately stored/fed as bf16 (per perf review)
        # while the reference runs f32 HIGHEST end-to-end; expected deviation is
        # ~1-2% of the output scale, so tolerance is 3% of max|ref| + 3e-2.
        ref_mag = float(jnp.max(jnp.abs(ref)))
        err = float(jnp.max(jnp.abs(out - ref)))
        assert err < 3e-2 * ref_mag + 3e-2, f"case {i}: err={err} (ref_mag={ref_mag})"

    print("KERNEL_OK")
</pallas_src>

<mosaic_0001>
module attributes {stable_mosaic.version = 11 : i64} {
  func.func @_pw_kernel(%arg0: i32, %arg1: memref<512x8xf32, #tpu.memory_space<vmem>>, %arg2: memref<8x32xbf16, #tpu.memory_space<vmem>>, %arg3: memref<1x32xf32, #tpu.memory_space<vmem>>, %arg4: memref<1x32xf32, #tpu.memory_space<vmem>>, %arg5: memref<512x32xbf16, #tpu.memory_space<vmem>>) attributes {dimension_semantics = [#tpu.dimension_semantics<parallel>], iteration_bounds = array<i64: 1>, scalar_prefetch = 0 : i64, scratch_operands = 0 : i64, tpu.core_type = #tpu.core_type<tc>, window_params = [{transform_indices = @transform_0, window_bounds = array<i64: 512, 8>}, {pipeline_mode = #tpu.pipeline_mode<synchronous>, transform_indices = @transform_1, window_bounds = array<i64: 8, 32>}, {pipeline_mode = #tpu.pipeline_mode<synchronous>, transform_indices = @transform_2, window_bounds = array<i64: 1, 32>}, {pipeline_mode = #tpu.pipeline_mode<synchronous>, transform_indices = @transform_3, window_bounds = array<i64: 1, 32>}, {transform_indices = @transform_4, window_bounds = array<i64: 512, 32>}]} {
    %c0 = arith.constant 0 : index
    %c0_0 = arith.constant 0 : index
    %0 = vector.load %arg1[%c0, %c0_0] : memref<512x8xf32, #tpu.memory_space<vmem>>, vector<512x8xf32>
    %1 = arith.truncf %0 : vector<512x8xf32> to vector<512x8xbf16>
    %c0_1 = arith.constant 0 : index
    %c0_2 = arith.constant 0 : index
    %2 = vector.load %arg2[%c0_1, %c0_2] : memref<8x32xbf16, #tpu.memory_space<vmem>>, vector<8x32xbf16>
    %cst = arith.constant dense<0.000000e+00> : vector<512x32xf32>
    %3 = tpu.matmul %1, %2, %cst {dimension_numbers = #tpu.dot_dimension_numbers<[1], [0], [0], [1], [0, 0, 1, 1], [], []>} : vector<512x8xbf16>, vector<8x32xbf16>, vector<512x32xf32> -> vector<512x32xf32>
    %c0_3 = arith.constant 0 : index
    %c0_4 = arith.constant 0 : index
    %4 = vector.load %arg3[%c0_3, %c0_4] : memref<1x32xf32, #tpu.memory_space<vmem>>, vector<1x32xf32>
    %5 = vector.broadcast %4 : vector<1x32xf32> to vector<512x32xf32>
    %6 = arith.mulf %3, %5 : vector<512x32xf32>
    %c0_5 = arith.constant 0 : index
    %c0_6 = arith.constant 0 : index
    %7 = vector.load %arg4[%c0_5, %c0_6] : memref<1x32xf32, #tpu.memory_space<vmem>>, vector<1x32xf32>
    %8 = vector.broadcast %7 : vector<1x32xf32> to vector<512x32xf32>
    %9 = arith.addf %6, %8 : vector<512x32xf32>
    %cst_7 = arith.constant 0.000000e+00 : f32
    %cst_8 = arith.constant 6.000000e+00 : f32
    %10 = vector.broadcast %cst_7 : f32 to vector<512x32xf32>
    %11 = arith.maximumf %10, %9 : vector<512x32xf32>
    %12 = vector.broadcast %cst_8 : f32 to vector<512x32xf32>
    %13 = arith.minimumf %12, %11 : vector<512x32xf32>
    %14 = arith.truncf %13 : vector<512x32xf32> to vector<512x32xbf16>
    %c0_9 = arith.constant 0 : index
    %c0_10 = arith.constant 0 : index
    %15 = vector.load %arg5[%c0_9, %c0_10] : memref<512x32xbf16, #tpu.memory_space<vmem>>, vector<512x32xbf16>
    tpu.vector_store %arg5[%c0_9, %c0_10], %14 {strides = array<i32>} : memref<512x32xbf16, #tpu.memory_space<vmem>>, vector<512x32xbf16>,
    return
  }
  func.func @transform_0(%arg0: i32) -> (i32, i32) {
    %c0_i32 = arith.constant 0 : i32
    %c0_i32_0 = arith.constant 0 : i32
    return %arg0, %c0_i32 : i32, i32
  }
  func.func @transform_1(%arg0: i32) -> (i32, i32) {
    %c0_i32 = arith.constant 0 : i32
    %c0_i32_0 = arith.constant 0 : i32
    %c0_i32_1 = arith.constant 0 : i32
    return %c0_i32, %c0_i32_0 : i32, i32
  }
  func.func @transform_2(%arg0: i32) -> (i32, i32) {
    %c0_i32 = arith.constant 0 : i32
    %c0_i32_0 = arith.constant 0 : i32
    %c0_i32_1 = arith.constant 0 : i32
    return %c0_i32, %c0_i32_0 : i32, i32
  }
  func.func @transform_3(%arg0: i32) -> (i32, i32) {
    %c0_i32 = arith.constant 0 : i32
    %c0_i32_0 = arith.constant 0 : i32
    %c0_i32_1 = arith.constant 0 : i32
    return %c0_i32, %c0_i32_0 : i32, i32
  }
  func.func @transform_4(%arg0: i32) -> (i32, i32) {
    %c0_i32 = arith.constant 0 : i32
    %c0_i32_0 = arith.constant 0 : i32
    return %arg0, %c0_i32 : i32, i32
  }
}

</mosaic_0001>

<bundles_post_ra>
// kernel: tpu_custom_call.1
= control target key start
LH: loop header
LB: loop body
LE: loop exit
PB: predicated region body
PF: predicated region fallthrough
CT: control target
= control target key end

     0   :  { %vm212_vm0 = vcmask 1043456   ;;  %vm115_vm1 = vcmask 64512   ;;  %vm1031_vm2 = vcmask 257024   ;;  %s2077_s1 = inlined_call_operand.vmem [shape: bf16[8,32], index: 1, kind: input, shape index: {}]   ;;  %s2078_s0 = inlined_call_operand.vmem [shape: f32[512,8], index: 0, kind: input, shape index: {}]   ;;  %s2079_s2 = inlined_call_operand.vmem [shape: f32[1,32], index: 2, kind: input, shape index: {}]   ;;  %s2080_s3 = inlined_call_operand.vmem [shape: f32[1,32], index: 3, kind: input, shape index: {}]   ;;  %s2081_s4 = inlined_call_operand.vmem [shape: bf16[512,32], index: 4, kind: output, shape index: {}]  }
   0x1   :  { %v114_v0 = vld [vmem:[%s2077_s1] sm:$0xf]  ;;  %v19_v2 = vld [vmem:[%s2078_s0 + $0x8] sm:$0xff]  ;;  %v20_v7 = vld [vmem:[%s2078_s0 + $0x10] sm:$0xff] }
   0x2   :  { %v18_v1 = vld [vmem:[%s2078_s0] sm:$0xff]  ;;  %1363 = vmatprep.subr.msk.bf16.mxu0 %vm212_vm0, %v114_v0  ;;  %1364 = vmatprep.subr.msk.bf16.mxu1 %vm212_vm0, %v114_v0  ;;  %v214_v3 = vsel %vm212_vm0, %v114_v0, 0  ;;  %v51_v6 = vld [vmem:[%s2078_s0 + $0x108] sm:$0xff]  ;;  %v21_v9 = vld [vmem:[%s2078_s0 + $0x18] sm:$0xff] }
   0x3   :  { %v82_v4 = vpack.c.bf16 %v19_v2, %v18_v1  ;;  %v50_v5 = vld [vmem:[%s2078_s0 + $0x100] sm:$0xff]  ;;  %1296 = vmatpush3.bf16.msra.mxu0 %v214_v3  ;;  %1362 = vmatpush3.bf16.msra.mxu1 %v214_v3  ;;  %v52_v10 = vld [vmem:[%s2078_s0 + $0x110] sm:$0xff]  ;;  %v53_v11 = vld [vmem:[%s2078_s0 + $0x118] sm:$0xff]  ;;  %v83_v12 = vpack.c.bf16 %v21_v9, %v20_v7 }
   0x4   :  { %v98_v8 = vpack.c.bf16 %v51_v6, %v50_v5  ;;  %v99_v13 = vpack.c.bf16 %v53_v11, %v52_v10  ;;  %v22_v14 = vld [vmem:[%s2078_s0 + $0x20] sm:$0xff]  ;;  %v23_v15 = vld [vmem:[%s2078_s0 + $0x28] sm:$0xff]  ;;  %v24_v20 = vld [vmem:[%s2078_s0 + $0x30] sm:$0xff] }
   0x5   :  { %1297 = vmatprep.mubr.msk.bf16.mxu0 %vm115_vm1, %v82_v4  ;;  %v54_v16 = vld [vmem:[%s2078_s0 + $0x120] sm:$0xff]  ;;  %v84_v17 = vpack.c.bf16 %v23_v15, %v22_v14  ;;  %v55_v18 = vld [vmem:[%s2078_s0 + $0x128] sm:$0xff]  ;;  %v25_v21 = vld [vmem:[%s2078_s0 + $0x38] sm:$0xff] }
   0x6   :  { %1329 = vmatprep.mubr.msk.bf16.mxu1 %vm115_vm1, %v98_v8  ;;  %1298 = vmatmul.mubr.msk.bf16.vlgmr.msra.gmra.mrb[0].mxu0 %vm115_vm1, %v83_v12  ;;  %v100_v19 = vpack.c.bf16 %v55_v18, %v54_v16  ;;  %v56_v22 = vld [vmem:[%s2078_s0 + $0x130] sm:$0xff]  ;;  %v57_v23 = vld [vmem:[%s2078_s0 + $0x138] sm:$0xff]  ;;  %v26_v24 = vld [vmem:[%s2078_s0 + $0x40] sm:$0xff]  ;;  %v85_v28 = vpack.c.bf16 %v25_v21, %v24_v20 }
   0x7   :  { %1330 = vmatmul.mubr.msk.bf16.vlgmr.msra.gmra.mrb[0].mxu1 %vm115_vm1, %v99_v13  ;;  %1301 = vmatprep.mubr.msk.bf16.mxu0 %vm115_vm1, %v84_v17  ;;  %v27_v25 = vld [vmem:[%s2078_s0 + $0x48] sm:$0xff]  ;;  %v58_v26 = vld [vmem:[%s2078_s0 + $0x140] sm:$0xff]  ;;  %v101_v29 = vpack.c.bf16 %v57_v23, %v56_v22  ;;  %v28_v32 = vld [vmem:[%s2078_s0 + $0x50] sm:$0xff] }
   0x8   :  { %1333 = vmatprep.mubr.msk.bf16.mxu1 %vm115_vm1, %v100_v19  ;;  %v59_v27 = vld [vmem:[%s2078_s0 + $0x148] sm:$0xff]  ;;  %v86_v30 = vpack.c.bf16 %v27_v25, %v26_v24  ;;  %v29_v33 = vld [vmem:[%s2078_s0 + $0x58] sm:$0xff]  ;;  %v60_v34 = vld [vmem:[%s2078_s0 + $0x150] sm:$0xff] }
   0x9   :  { %v102_v31 = vpack.c.bf16 %v59_v27, %v58_v26  ;;  %v61_v35 = vld [vmem:[%s2078_s0 + $0x158] sm:$0xff]  ;;  %v30_v36 = vld [vmem:[%s2078_s0 + $0x60] sm:$0xff]  ;;  %v31_v37 = vld [vmem:[%s2078_s0 + $0x68] sm:$0xff]  ;;  %v87_v40 = vpack.c.bf16 %v29_v33, %v28_v32 }
   0xa   :  { %v62_v38 = vld [vmem:[%s2078_s0 + $0x160] sm:$0xff]  ;;  %v63_v39 = vld [vmem:[%s2078_s0 + $0x168] sm:$0xff]  ;;  %v103_v41 = vpack.c.bf16 %v61_v35, %v60_v34  ;;  %v88_v42 = vpack.c.bf16 %v31_v37, %v30_v36  ;;  %v32_v44 = vld [vmem:[%s2078_s0 + $0x70] sm:$0xff] }
   0xb   :  { %v104_v43 = vpack.c.bf16 %v63_v39, %v62_v38  ;;  %v33_v45 = vld [vmem:[%s2078_s0 + $0x78] sm:$0xff]  ;;  %v64_v46 = vld [vmem:[%s2078_s0 + $0x170] sm:$0xff]  ;;  %v34_v48 = vld [vmem:[%s2078_s0 + $0x80] sm:$0xff] }
   0xc   :  { %v65_v47 = vld [vmem:[%s2078_s0 + $0x178] sm:$0xff]  ;;  %v35_v49 = vld [vmem:[%s2078_s0 + $0x88] sm:$0xff]  ;;  %v66_v50 = vld [vmem:[%s2078_s0 + $0x180] sm:$0xff]  ;;  %v89_v52 = vpack.c.bf16 %v33_v45, %v32_v44 }
   0xd   :  { %v67_v51 = vld [vmem:[%s2078_s0 + $0x188] sm:$0xff]  ;;  %v105_v53 = vpack.c.bf16 %v65_v47, %v64_v46  ;;  %v90_v54 = vpack.c.bf16 %v35_v49, %v34_v48  ;;  %v36_v56 = vld [vmem:[%s2078_s0 + $0x90] sm:$0xff]  ;;  %v37_v57 = vld [vmem:[%s2078_s0 + $0x98] sm:$0xff] }
   0xe   :  { %1302 = vmatmul.mubr.msk.bf16.gmra.mrb[4].mxu0 %vm115_vm1, %v85_v28  ;;  %v106_v55 = vpack.c.bf16 %v67_v51, %v66_v50  ;;  %v68_v58 = vld [vmem:[%s2078_s0 + $0x190] sm:$0xff]  ;;  %v69_v59 = vld [vmem:[%s2078_s0 + $0x198] sm:$0xff]  ;;  %v38_v60 = vld [vmem:[%s2078_s0 + $0xa0] sm:$0xff]  ;;  %v91_v0 = vpack.c.bf16 %v37_v57, %v36_v56 }
   0xf   :  { %1334 = vmatmul.mubr.msk.bf16.gmra.mrb[4].mxu1 %vm115_vm1, %v101_v29  ;;  %1305 = vmatprep.mubr.msk.bf16.mxu0 %vm115_vm1, %v86_v30  ;;  %v39_v61 = vld [vmem:[%s2078_s0 + $0xa8] sm:$0xff]  ;;  %v70_v62 = vld [vmem:[%s2078_s0 + $0x1a0] sm:$0xff]  ;;  %v107_v1 = vpack.c.bf16 %v69_v59, %v68_v58  ;;  %v40_v4 = vld [vmem:[%s2078_s0 + $0xb0] sm:$0xff] }
  0x10   :  { %1337 = vmatprep.mubr.msk.bf16.mxu1 %vm115_vm1, %v102_v31  ;;  %v71_v63 = vld [vmem:[%s2078_s0 + $0x1a8] sm:$0xff]  ;;  %v92_v2 = vpack.c.bf16 %v39_v61, %v38_v60  ;;  %v41_v5 = vld [vmem:[%s2078_s0 + $0xb8] sm:$0xff]  ;;  %v72_v6 = vld [vmem:[%s2078_s0 + $0x1b0] sm:$0xff] }
  0x11   :  { %v108_v3 = vpack.c.bf16 %v71_v63, %v70_v62  ;;  %v73_v7 = vld [vmem:[%s2078_s0 + $0x1b8] sm:$0xff]  ;;  %v42_v8 = vld [vmem:[%s2078_s0 + $0xc0] sm:$0xff]  ;;  %v43_v9 = vld [vmem:[%s2078_s0 + $0xc8] sm:$0xff]  ;;  %v93_v12 = vpack.c.bf16 %v41_v5, %v40_v4 }
  0x12   :  { %v74_v10 = vld [vmem:[%s2078_s0 + $0x1c0] sm:$0xff]  ;;  %v75_v11 = vld [vmem:[%s2078_s0 + $0x1c8] sm:$0xff]  ;;  %v109_v13 = vpack.c.bf16 %v73_v7, %v72_v6  ;;  %v94_v14 = vpack.c.bf16 %v43_v9, %v42_v8  ;;  %v44_v16 = vld [vmem:[%s2078_s0 + $0xd0] sm:$0xff] }
  0x13   :  { %v110_v15 = vpack.c.bf16 %v75_v11, %v74_v10  ;;  %v45_v17 = vld [vmem:[%s2078_s0 + $0xd8] sm:$0xff]  ;;  %v76_v18 = vld [vmem:[%s2078_s0 + $0x1d0] sm:$0xff]  ;;  %v46_v20 = vld [vmem:[%s2078_s0 + $0xe0] sm:$0xff] }
  0x14   :  { %v77_v19 = vld [vmem:[%s2078_s0 + $0x1d8] sm:$0xff]  ;;  %v47_v21 = vld [vmem:[%s2078_s0 + $0xe8] sm:$0xff]  ;;  %v78_v22 = vld [vmem:[%s2078_s0 + $0x1e0] sm:$0xff]  ;;  %v95_v24 = vpack.c.bf16 %v45_v17, %v44_v16 }
  0x15   :  { %v79_v23 = vld [vmem:[%s2078_s0 + $0x1e8] sm:$0xff]  ;;  %v111_v25 = vpack.c.bf16 %v77_v19, %v76_v18  ;;  %v96_v26 = vpack.c.bf16 %v47_v21, %v46_v20  ;;  %v48_v28 = vld [vmem:[%s2078_s0 + $0xf0] sm:$0xff]  ;;  %v49_v29 = vld [vmem:[%s2078_s0 + $0xf8] sm:$0xff] }
  0x16   :  { %1306 = vmatmul.mubr.msk.bf16.gmra.mrb[8].mxu0 %vm115_vm1, %v87_v40  ;;  %v112_v27 = vpack.c.bf16 %v79_v23, %v78_v22  ;;  %v80_v30 = vld [vmem:[%s2078_s0 + $0x1f0] sm:$0xff]  ;;  %v81_v31 = vld [vmem:[%s2078_s0 + $0x1f8] sm:$0xff]  ;;  %v97_v32 = vpack.c.bf16 %v49_v29, %v48_v28  ;;  %v1620_v34 = vld [vmem:[%s2079_s2] ss:$0 sm:$0xff] }
  0x17   :  { %1338 = vmatmul.mubr.msk.bf16.gmra.mrb[8].mxu1 %vm115_vm1, %v103_v41  ;;  %1309 = vmatprep.mubr.msk.bf16.mxu0 %vm115_vm1, %v88_v42  ;;  %v113_v33 = vpack.c.bf16 %v81_v31, %v80_v30  ;;  %v1625_v36 = vld [vmem:[%s2080_s3] ss:$0 sm:$0xff] }
  0x18   :  { %1341 = vmatprep.mubr.msk.bf16.mxu1 %vm115_vm1, %v104_v43 }
  0x1e   :  { %1310 = vmatmul.mubr.msk.bf16.gmra.mrb[12].mxu0 %vm115_vm1, %v89_v52 }
  0x1f   :  { %1342 = vmatmul.mubr.msk.bf16.gmra.mrb[12].mxu1 %vm115_vm1, %v105_v53  ;;  %1313 = vmatprep.mubr.msk.bf16.mxu0 %vm115_vm1, %v90_v54 }
  0x20   :  { %1345 = vmatprep.mubr.msk.bf16.mxu1 %vm115_vm1, %v106_v55 }
  0x26   :  { %1314 = vmatmul.mubr.msk.bf16.gmra.mrb[16].mxu0 %vm115_vm1, %v91_v0 }
  0x27   :  { %1346 = vmatmul.mubr.msk.bf16.gmra.mrb[16].mxu1 %vm115_vm1, %v107_v1  ;;  %1317 = vmatprep.mubr.msk.bf16.mxu0 %vm115_vm1, %v92_v2 }
  0x28   :  { %1349 = vmatprep.mubr.msk.bf16.mxu1 %vm115_vm1, %v108_v3 }
  0x2e   :  { %1318 = vmatmul.mubr.msk.bf16.gmra.mrb[20].mxu0 %vm115_vm1, %v93_v12 }
  0x2f   :  { %1350 = vmatmul.mubr.msk.bf16.gmra.mrb[20].mxu1 %vm115_vm1, %v109_v13  ;;  %1321 = vmatprep.mubr.msk.bf16.mxu0 %vm115_vm1, %v94_v14 }
  0x30   :  { %1353 = vmatprep.mubr.msk.bf16.mxu1 %vm115_vm1, %v110_v15 }
  0x36   :  { %1322 = vmatmul.mubr.msk.bf16.gmra.mrb[24].mxu0 %vm115_vm1, %v95_v24 }
  0x37   :  { %1354 = vmatmul.mubr.msk.bf16.gmra.mrb[24].mxu1 %vm115_vm1, %v111_v25  ;;  %1325 = vmatprep.mubr.msk.bf16.mxu0 %vm115_vm1, %v96_v26 }
  0x38   :  { %1357 = vmatprep.mubr.msk.bf16.mxu1 %vm115_vm1, %v112_v27 }
  0x3e   :  { %1326 = vmatmul.mubr.msk.bf16.gmra.mrb[28].mxu0 %vm115_vm1, %v97_v32 }
  0x3f   :  { %1358 = vmatmul.mubr.msk.bf16.gmra.mrb[28].mxu1 %vm115_vm1, %v113_v33 }
  0xd9   :  { %v1299_v35 = vpop.f32.mrb[0].mxu0 }
  0xda   :  { %v1331_v37 = vpop.f32.mrb[0].mxu1  ;;  %v514_v38 = vmul.f32 %v1299_v35, %v1620_v34  ;;  %v250_v40 = vpop.f32.mrb[1].mxu0 }
  0xdb   :  { %v546_v39 = vmul.f32 %v1331_v37, %v1620_v34  ;;  %v378_v41 = vpop.f32.mrb[1].mxu1  ;;  %v512_v42 = vmul.f32 %v1620_v34, %v250_v40  ;;  %v1300_v44 = vpop.f32.mrb[2].mxu0 }
  0xdc   :  { %v544_v43 = vmul.f32 %v1620_v34, %v378_v41  ;;  %v1332_v45 = vpop.f32.mrb[2].mxu1  ;;  %v585_v46 = vadd.f32 %v1625_v36, %v514_v38  ;;  %v515_v48 = vmul.f32 %v1300_v44, %v1620_v34  ;;  %v253_v50 = vpop.f32.mrb[3].mxu0 }
  0xdd   :  { %v617_v47 = vadd.f32 %v1625_v36, %v546_v39  ;;  %v547_v49 = vmul.f32 %v1332_v45, %v1620_v34  ;;  %v381_v51 = vpop.f32.mrb[3].mxu1  ;;  %v583_v52 = vadd.f32 %v1625_v36, %v512_v42  ;;  %v513_v54 = vmul.f32 %v1620_v34, %v253_v50 }
  0xde   :  { %v615_v53 = vadd.f32 %v1625_v36, %v544_v43  ;;  %v545_v55 = vmul.f32 %v1620_v34, %v381_v51  ;;  %v649_v56 = vmax.f32 %v585_v46, 0.0  ;;  %v586_v58 = vadd.f32 %v1625_v36, %v515_v48 }
  0xdf   :  { %v681_v57 = vmax.f32 %v617_v47, 0.0  ;;  %v618_v59 = vadd.f32 %v1625_v36, %v547_v49  ;;  %v647_v60 = vmax.f32 %v583_v52, 0.0  ;;  %v584_v62 = vadd.f32 %v1625_v36, %v513_v54 }
  0xe0   :  { %v679_v61 = vmax.f32 %v615_v53, 0.0  ;;  %v616_v63 = vadd.f32 %v1625_v36, %v545_v55  ;;  %v713_v0 = vmin.f32 %v649_v56, 6.0  ;;  %v650_v2 = vmax.f32 %v586_v58, 0.0 }
  0xe1   :  { %v745_v1 = vmin.f32 %v681_v57, 6.0  ;;  %v682_v3 = vmax.f32 %v618_v59, 0.0  ;;  %v711_v4 = vmin.f32 %v647_v60, 6.0  ;;  %v648_v6 = vmax.f32 %v584_v62, 0.0  ;;  %v1303_v8 = vpop.f32.mrb[4].mxu0 }
  0xe2   :  { %v743_v5 = vmin.f32 %v679_v61, 6.0  ;;  %v680_v7 = vmax.f32 %v616_v63, 0.0  ;;  %v1335_v9 = vpop.f32.mrb[4].mxu1  ;;  %v1200_v10 = vpack.c.bf16 %v713_v0, %v713_v0  ;;  %v714_v12 = vmin.f32 %v650_v2, 6.0  ;;  %v266_v14 = vpop.f32.mrb[5].mxu0 }
  0xe3   :  { %v1232_v11 = vpack.c.bf16 %v745_v1, %v745_v1  ;;  %v746_v13 = vmin.f32 %v682_v3, 6.0  ;;  %v394_v15 = vpop.f32.mrb[5].mxu1  ;;  %v1198_v16 = vpack.c.bf16 %v711_v4, %v711_v4  ;;  %v712_v18 = vmin.f32 %v648_v6, 6.0  ;;  %v1304_v20 = vpop.f32.mrb[6].mxu0 }
  0xe4   :  { %v1230_v17 = vpack.c.bf16 %v743_v5, %v743_v5  ;;  %v744_v19 = vmin.f32 %v680_v7, 6.0  ;;  %v1336_v21 = vpop.f32.mrb[6].mxu1  ;;  %1034 = vst.msk [vmem:[%s2081_s4 + $0x8] sm:$0xf] %vm1031_vm2, %v1200_v10  ;;  %v1201_v22 = vpack.c.bf16 %v714_v12, %v714_v12  ;;  %v518_v24 = vmul.f32 %v1303_v8, %v1620_v34  ;;  %v269_v26 = vpop.f32.mrb[7].mxu0 }
  0xe5   :  { %1066 = vst.msk [vmem:[%s2081_s4 + $0x88] sm:$0xf] %vm1031_vm2, %v1232_v11  ;;  %v1233_v23 = vpack.c.bf16 %v746_v13, %v746_v13  ;;  %v550_v25 = vmul.f32 %v1335_v9, %v1620_v34  ;;  %v397_v27 = vpop.f32.mrb[7].mxu1  ;;  %1032 = vst.msk [vmem:[%s2081_s4] sm:$0xf] %vm1031_vm2, %v1198_v16  ;;  %v1199_v28 = vpack.c.bf16 %v712_v18, %v712_v18 }
  0xe6   :  { %1064 = vst.msk [vmem:[%s2081_s4 + $0x80] sm:$0xf] %vm1031_vm2, %v1230_v17  ;;  %v1231_v29 = vpack.c.bf16 %v744_v19, %v744_v19  ;;  %v516_v30 = vmul.f32 %v1620_v34, %v266_v14  ;;  %v548_v31 = vmul.f32 %v1620_v34, %v394_v15  ;;  %1035 = vst.msk [vmem:[%s2081_s4 + $0xc] sm:$0xf] %vm1031_vm2, %v1201_v22 }
  0xe7   :  { %1067 = vst.msk [vmem:[%s2081_s4 + $0x8c] sm:$0xf] %vm1031_vm2, %v1233_v23  ;;  %v589_v32 = vadd.f32 %v1625_v36, %v518_v24  ;;  %v621_v33 = vadd.f32 %v1625_v36, %v550_v25  ;;  %v519_v35 = vmul.f32 %v1304_v20, %v1620_v34  ;;  %v551_v37 = vmul.f32 %v1336_v21, %v1620_v34 }
  0xe8   :  { %1033 = vst.msk [vmem:[%s2081_s4 + $0x4] sm:$0xf] %vm1031_vm2, %v1199_v28  ;;  %1065 = vst.msk [vmem:[%s2081_s4 + $0x84] sm:$0xf] %vm1031_vm2, %v1231_v29  ;;  %v587_v38 = vadd.f32 %v1625_v36, %v516_v30  ;;  %v619_v39 = vadd.f32 %v1625_v36, %v548_v31  ;;  %v517_v40 = vmul.f32 %v1620_v34, %v269_v26 }
  0xe9   :  { %v549_v41 = vmul.f32 %v1620_v34, %v397_v27  ;;  %v653_v42 = vmax.f32 %v589_v32, 0.0  ;;  %v685_v43 = vmax.f32 %v621_v33, 0.0  ;;  %v590_v44 = vadd.f32 %v1625_v36, %v519_v35  ;;  %v1307_v50 = vpop.f32.mrb[8].mxu0 }
  0xea   :  { %v622_v45 = vadd.f32 %v1625_v36, %v551_v37  ;;  %v651_v46 = vmax.f32 %v587_v38, 0.0  ;;  %v683_v47 = vmax.f32 %v619_v39, 0.0  ;;  %v588_v48 = vadd.f32 %v1625_v36, %v517_v40  ;;  %v1339_v51 = vpop.f32.mrb[8].mxu1  ;;  %v282_v56 = vpop.f32.mrb[9].mxu0 }
  0xeb   :  { %v620_v49 = vadd.f32 %v1625_v36, %v549_v41  ;;  %v717_v52 = vmin.f32 %v653_v42, 6.0  ;;  %v749_v53 = vmin.f32 %v685_v43, 6.0  ;;  %v654_v54 = vmax.f32 %v590_v44, 0.0  ;;  %v410_v57 = vpop.f32.mrb[9].mxu1  ;;  %v1308_v62 = vpop.f32.mrb[10].mxu0 }
  0xec   :  { %v686_v55 = vmax.f32 %v622_v45, 0.0  ;;  %v715_v58 = vmin.f32 %v651_v46, 6.0  ;;  %v747_v59 = vmin.f32 %v683_v47, 6.0  ;;  %v652_v60 = vmax.f32 %v588_v48, 0.0  ;;  %v1340_v63 = vpop.f32.mrb[10].mxu1  ;;  %v285_v4 = vpop.f32.mrb[11].mxu0 }
  0xed   :  { %v684_v61 = vmax.f32 %v620_v49, 0.0  ;;  %v1204_v0 = vpack.c.bf16 %v717_v52, %v717_v52  ;;  %v1236_v1 = vpack.c.bf16 %v749_v53, %v749_v53  ;;  %v718_v2 = vmin.f32 %v654_v54, 6.0  ;;  %v413_v5 = vpop.f32.mrb[11].mxu1 }
  0xee   :  { %v750_v3 = vmin.f32 %v686_v55, 6.0  ;;  %v1202_v6 = vpack.c.bf16 %v715_v58, %v715_v58  ;;  %v1234_v7 = vpack.c.bf16 %v747_v59, %v747_v59  ;;  %v716_v8 = vmin.f32 %v652_v60, 6.0 }
  0xef   :  { %v748_v9 = vmin.f32 %v684_v61, 6.0  ;;  %1038 = vst.msk [vmem:[%s2081_s4 + $0x18] sm:$0xf] %vm1031_vm2, %v1204_v0  ;;  %1070 = vst.msk [vmem:[%s2081_s4 + $0x98] sm:$0xf] %vm1031_vm2, %v1236_v1  ;;  %v1205_v10 = vpack.c.bf16 %v718_v2, %v718_v2  ;;  %v522_v12 = vmul.f32 %v1307_v50, %v1620_v34  ;;  %v554_v13 = vmul.f32 %v1339_v51, %v1620_v34 }
  0xf0   :  { %v1237_v11 = vpack.c.bf16 %v750_v3, %v750_v3  ;;  %1036 = vst.msk [vmem:[%s2081_s4 + $0x10] sm:$0xf] %vm1031_vm2, %v1202_v6  ;;  %1068 = vst.msk [vmem:[%s2081_s4 + $0x90] sm:$0xf] %vm1031_vm2, %v1234_v7  ;;  %v1203_v14 = vpack.c.bf16 %v716_v8, %v716_v8  ;;  %v520_v16 = vmul.f32 %v1620_v34, %v282_v56 }
  0xf1   :  { %v1235_v15 = vpack.c.bf16 %v748_v9, %v748_v9  ;;  %v552_v17 = vmul.f32 %v1620_v34, %v410_v57  ;;  %1039 = vst.msk [vmem:[%s2081_s4 + $0x1c] sm:$0xf] %vm1031_vm2, %v1205_v10  ;;  %v593_v18 = vadd.f32 %v1625_v36, %v522_v12  ;;  %v625_v19 = vadd.f32 %v1625_v36, %v554_v13  ;;  %v1311_v26 = vpop.f32.mrb[12].mxu0 }
  0xf2   :  { %1071 = vst.msk [vmem:[%s2081_s4 + $0x9c] sm:$0xf] %vm1031_vm2, %v1237_v11  ;;  %v523_v20 = vmul.f32 %v1308_v62, %v1620_v34  ;;  %v555_v21 = vmul.f32 %v1340_v63, %v1620_v34  ;;  %1037 = vst.msk [vmem:[%s2081_s4 + $0x14] sm:$0xf] %vm1031_vm2, %v1203_v14  ;;  %v591_v22 = vadd.f32 %v1625_v36, %v520_v16  ;;  %v1343_v27 = vpop.f32.mrb[12].mxu1  ;;  %v298_v32 = vpop.f32.mrb[13].mxu0 }
  0xf3   :  { %1069 = vst.msk [vmem:[%s2081_s4 + $0x94] sm:$0xf] %vm1031_vm2, %v1235_v15  ;;  %v623_v23 = vadd.f32 %v1625_v36, %v552_v17  ;;  %v521_v24 = vmul.f32 %v1620_v34, %v285_v4  ;;  %v553_v25 = vmul.f32 %v1620_v34, %v413_v5  ;;  %v657_v28 = vmax.f32 %v593_v18, 0.0  ;;  %v426_v33 = vpop.f32.mrb[13].mxu1  ;;  %v1312_v40 = vpop.f32.mrb[14].mxu0 }
  0xf4   :  { %v689_v29 = vmax.f32 %v625_v19, 0.0  ;;  %v594_v30 = vadd.f32 %v1625_v36, %v523_v20  ;;  %v626_v31 = vadd.f32 %v1625_v36, %v555_v21  ;;  %v655_v35 = vmax.f32 %v591_v22, 0.0  ;;  %v1344_v41 = vpop.f32.mrb[14].mxu1  ;;  %v301_v46 = vpop.f32.mrb[15].mxu0 }
  0xf5   :  { %v687_v37 = vmax.f32 %v623_v23, 0.0  ;;  %v592_v38 = vadd.f32 %v1625_v36, %v521_v24  ;;  %v624_v39 = vadd.f32 %v1625_v36, %v553_v25  ;;  %v721_v42 = vmin.f32 %v657_v28, 6.0  ;;  %v429_v47 = vpop.f32.mrb[15].mxu1 }
  0xf6   :  { %v753_v43 = vmin.f32 %v689_v29, 6.0  ;;  %v658_v44 = vmax.f32 %v594_v30, 0.0  ;;  %v690_v45 = vmax.f32 %v626_v31, 0.0  ;;  %v719_v48 = vmin.f32 %v655_v35, 6.0 }
  0xf7   :  { %v751_v49 = vmin.f32 %v687_v37, 6.0  ;;  %v656_v50 = vmax.f32 %v592_v38, 0.0  ;;  %v688_v51 = vmax.f32 %v624_v39, 0.0  ;;  %v1208_v52 = vpack.c.bf16 %v721_v42, %v721_v42 }
  0xf8   :  { %v1240_v53 = vpack.c.bf16 %v753_v43, %v753_v43  ;;  %v722_v54 = vmin.f32 %v658_v44, 6.0  ;;  %v754_v55 = vmin.f32 %v690_v45, 6.0  ;;  %v1206_v56 = vpack.c.bf16 %v719_v48, %v719_v48 }
  0xf9   :  { %v1238_v57 = vpack.c.bf16 %v751_v49, %v751_v49  ;;  %v720_v58 = vmin.f32 %v656_v50, 6.0  ;;  %v752_v59 = vmin.f32 %v688_v51, 6.0  ;;  %1042 = vst.msk [vmem:[%s2081_s4 + $0x28] sm:$0xf] %vm1031_vm2, %v1208_v52  ;;  %v526_v62 = vmul.f32 %v1311_v26, %v1620_v34  ;;  %v1315_v4 = vpop.f32.mrb[16].mxu0 }
  0xfa   :  { %1074 = vst.msk [vmem:[%s2081_s4 + $0xa8] sm:$0xf] %vm1031_vm2, %v1240_v53  ;;  %v1209_v60 = vpack.c.bf16 %v722_v54, %v722_v54  ;;  %v1241_v61 = vpack.c.bf16 %v754_v55, %v754_v55  ;;  %v558_v63 = vmul.f32 %v1343_v27, %v1620_v34  ;;  %1040 = vst.msk [vmem:[%s2081_s4 + $0x20] sm:$0xf] %vm1031_vm2, %v1206_v56  ;;  %v1347_v5 = vpop.f32.mrb[16].mxu1  ;;  %v314_v10 = vpop.f32.mrb[17].mxu0 }
  0xfb   :  { %1072 = vst.msk [vmem:[%s2081_s4 + $0xa0] sm:$0xf] %vm1031_vm2, %v1238_v57  ;;  %v1207_v0 = vpack.c.bf16 %v720_v58, %v720_v58  ;;  %v1239_v1 = vpack.c.bf16 %v752_v59, %v752_v59  ;;  %v524_v2 = vmul.f32 %v1620_v34, %v298_v32  ;;  %v556_v3 = vmul.f32 %v1620_v34, %v426_v33  ;;  %v442_v11 = vpop.f32.mrb[17].mxu1  ;;  %v1316_v16 = vpop.f32.mrb[18].mxu0 }
  0xfc   :  { %1043 = vst.msk [vmem:[%s2081_s4 + $0x2c] sm:$0xf] %vm1031_vm2, %v1209_v60  ;;  %1075 = vst.msk [vmem:[%s2081_s4 + $0xac] sm:$0xf] %vm1031_vm2, %v1241_v61  ;;  %v597_v6 = vadd.f32 %v1625_v36, %v526_v62  ;;  %v629_v7 = vadd.f32 %v1625_v36, %v558_v63  ;;  %v527_v8 = vmul.f32 %v1312_v40, %v1620_v34  ;;  %v1348_v17 = vpop.f32.mrb[18].mxu1  ;;  %v317_v22 = vpop.f32.mrb[19].mxu0 }
  0xfd   :  { %v559_v9 = vmul.f32 %v1344_v41, %v1620_v34  ;;  %1041 = vst.msk [vmem:[%s2081_s4 + $0x24] sm:$0xf] %vm1031_vm2, %v1207_v0  ;;  %1073 = vst.msk [vmem:[%s2081_s4 + $0xa4] sm:$0xf] %vm1031_vm2, %v1239_v1  ;;  %v595_v12 = vadd.f32 %v1625_v36, %v524_v2  ;;  %v627_v13 = vadd.f32 %v1625_v36, %v556_v3  ;;  %v445_v23 = vpop.f32.mrb[19].mxu1 }
  0xfe   :  { %v525_v14 = vmul.f32 %v1620_v34, %v301_v46  ;;  %v557_v15 = vmul.f32 %v1620_v34, %v429_v47  ;;  %v661_v18 = vmax.f32 %v597_v6, 0.0  ;;  %v693_v19 = vmax.f32 %v629_v7, 0.0 }
  0xff   :  { %v598_v20 = vadd.f32 %v1625_v36, %v527_v8  ;;  %v630_v21 = vadd.f32 %v1625_v36, %v559_v9  ;;  %v659_v24 = vmax.f32 %v595_v12, 0.0  ;;  %v691_v25 = vmax.f32 %v627_v13, 0.0 }
 0x100   :  { %v596_v26 = vadd.f32 %v1625_v36, %v525_v14  ;;  %v628_v27 = vadd.f32 %v1625_v36, %v557_v15  ;;  %v725_v28 = vmin.f32 %v661_v18, 6.0  ;;  %v757_v29 = vmin.f32 %v693_v19, 6.0 }
 0x101   :  { %v662_v30 = vmax.f32 %v598_v20, 0.0  ;;  %v694_v31 = vmax.f32 %v630_v21, 0.0  ;;  %v723_v32 = vmin.f32 %v659_v24, 6.0  ;;  %v755_v33 = vmin.f32 %v691_v25, 6.0  ;;  %v1787_v46 = vpop.f32.mrb[20].mxu0 }
 0x102   :  { %v660_v35 = vmax.f32 %v596_v26, 0.0  ;;  %v692_v37 = vmax.f32 %v628_v27, 0.0  ;;  %v1212_v38 = vpack.c.bf16 %v725_v28, %v725_v28  ;;  %v1244_v39 = vpack.c.bf16 %v757_v29, %v757_v29  ;;  %v1789_v47 = vpop.f32.mrb[20].mxu1  ;;  %v1801_v52 = vpop.f32.mrb[21].mxu0 }
 0x103   :  { %v726_v40 = vmin.f32 %v662_v30, 6.0  ;;  %v758_v41 = vmin.f32 %v694_v31, 6.0  ;;  %v1210_v42 = vpack.c.bf16 %v723_v32, %v723_v32  ;;  %v1242_v43 = vpack.c.bf16 %v755_v33, %v755_v33  ;;  %v1803_v53 = vpop.f32.mrb[21].mxu1  ;;  %v1815_v58 = vpop.f32.mrb[22].mxu0 }
 0x104   :  { %v724_v44 = vmin.f32 %v660_v35, 6.0  ;;  %v756_v45 = vmin.f32 %v692_v37, 6.0  ;;  %1046 = vst.msk [vmem:[%s2081_s4 + $0x38] sm:$0xf] %vm1031_vm2, %v1212_v38  ;;  %1078 = vst.msk [vmem:[%s2081_s4 + $0xb8] sm:$0xf] %vm1031_vm2, %v1244_v39  ;;  %v530_v50 = vmul.f32 %v1315_v4, %v1620_v34  ;;  %v562_v51 = vmul.f32 %v1347_v5, %v1620_v34 }
 0x105   :  { %v1213_v48 = vpack.c.bf16 %v726_v40, %v726_v40  ;;  %v1245_v49 = vpack.c.bf16 %v758_v41, %v758_v41  ;;  %1044 = vst.msk [vmem:[%s2081_s4 + $0x30] sm:$0xf] %vm1031_vm2, %v1210_v42  ;;  %1076 = vst.msk [vmem:[%s2081_s4 + $0xb0] sm:$0xf] %vm1031_vm2, %v1242_v43  ;;  %v528_v56 = vmul.f32 %v1620_v34, %v314_v10  ;;  %v1817_v59 = vpop.f32.mrb[22].mxu1  ;;  %v333_v0 = vpop.f32.mrb[23].mxu0 }
 0x106   :  { %v1211_v54 = vpack.c.bf16 %v724_v44, %v724_v44  ;;  %v1243_v55 = vpack.c.bf16 %v756_v45, %v756_v45  ;;  %v560_v57 = vmul.f32 %v1620_v34, %v442_v11  ;;  %v601_v60 = vadd.f32 %v1625_v36, %v530_v50  ;;  %v461_v1 = vpop.f32.mrb[23].mxu1 }
 0x107   :  { %1047 = vst.msk [vmem:[%s2081_s4 + $0x3c] sm:$0xf] %vm1031_vm2, %v1213_v48  ;;  %1079 = vst.msk [vmem:[%s2081_s4 + $0xbc] sm:$0xf] %vm1031_vm2, %v1245_v49  ;;  %v633_v61 = vadd.f32 %v1625_v36, %v562_v51  ;;  %v531_v62 = vmul.f32 %v1316_v16, %v1620_v34  ;;  %v563_v63 = vmul.f32 %v1348_v17, %v1620_v34 }
 0x108   :  { %1045 = vst.msk [vmem:[%s2081_s4 + $0x34] sm:$0xf] %vm1031_vm2, %v1211_v54  ;;  %1077 = vst.msk [vmem:[%s2081_s4 + $0xb4] sm:$0xf] %vm1031_vm2, %v1243_v55  ;;  %v599_v2 = vadd.f32 %v1625_v36, %v528_v56  ;;  %v631_v3 = vadd.f32 %v1625_v36, %v560_v57  ;;  %v529_v4 = vmul.f32 %v1620_v34, %v317_v22  ;;  %v665_v6 = vmax.f32 %v601_v60, 0.0 }
 0x109   :  { %v561_v5 = vmul.f32 %v1620_v34, %v445_v23  ;;  %v697_v7 = vmax.f32 %v633_v61, 0.0  ;;  %v602_v8 = vadd.f32 %v1625_v36, %v531_v62  ;;  %v634_v9 = vadd.f32 %v1625_v36, %v563_v63  ;;  %v1847_v22 = vpop.f32.mrb[24].mxu0 }
 0x10a   :  { %v663_v10 = vmax.f32 %v599_v2, 0.0  ;;  %v695_v11 = vmax.f32 %v631_v3, 0.0  ;;  %v600_v12 = vadd.f32 %v1625_v36, %v529_v4  ;;  %v729_v14 = vmin.f32 %v665_v6, 6.0  ;;  %v1849_v23 = vpop.f32.mrb[24].mxu1  ;;  %v1851_v28 = vpop.f32.mrb[25].mxu0 }
 0x10b   :  { %v632_v13 = vadd.f32 %v1625_v36, %v561_v5  ;;  %v761_v15 = vmin.f32 %v697_v7, 6.0  ;;  %v666_v16 = vmax.f32 %v602_v8, 0.0  ;;  %v698_v17 = vmax.f32 %v634_v9, 0.0  ;;  %v1853_v29 = vpop.f32.mrb[25].mxu1  ;;  %v1855_v35 = vpop.f32.mrb[26].mxu0 }
 0x10c   :  { %v727_v18 = vmin.f32 %v663_v10, 6.0  ;;  %v759_v19 = vmin.f32 %v695_v11, 6.0  ;;  %v664_v20 = vmax.f32 %v600_v12, 0.0  ;;  %v1216_v24 = vpack.c.bf16 %v729_v14, %v729_v14  ;;  %v1857_v37 = vpop.f32.mrb[26].mxu1  ;;  %v1871_v42 = vpop.f32.mrb[27].mxu0 }
 0x10d   :  { %v696_v21 = vmax.f32 %v632_v13, 0.0  ;;  %v1248_v25 = vpack.c.bf16 %v761_v15, %v761_v15  ;;  %v730_v26 = vmin.f32 %v666_v16, 6.0  ;;  %v762_v27 = vmin.f32 %v698_v17, 6.0  ;;  %v1873_v43 = vpop.f32.mrb[27].mxu1 }
 0x10e   :  { %v1214_v30 = vpack.c.bf16 %v727_v18, %v727_v18  ;;  %v1246_v31 = vpack.c.bf16 %v759_v19, %v759_v19  ;;  %v728_v32 = vmin.f32 %v664_v20, 6.0  ;;  %1050 = vst.msk [vmem:[%s2081_s4 + $0x48] sm:$0xf] %vm1031_vm2, %v1216_v24  ;;  %v534_v40 = vmul.f32 %v1787_v46, %v1620_v34 }
 0x10f   :  { %v760_v33 = vmin.f32 %v696_v21, 6.0  ;;  %1082 = vst.msk [vmem:[%s2081_s4 + $0xc8] sm:$0xf] %vm1031_vm2, %v1248_v25  ;;  %v1217_v38 = vpack.c.bf16 %v730_v26, %v730_v26  ;;  %v1249_v39 = vpack.c.bf16 %v762_v27, %v762_v27  ;;  %v566_v41 = vmul.f32 %v1789_v47, %v1620_v34 }
 0x110   :  { %1048 = vst.msk [vmem:[%s2081_s4 + $0x40] sm:$0xf] %vm1031_vm2, %v1214_v30  ;;  %1080 = vst.msk [vmem:[%s2081_s4 + $0xc0] sm:$0xf] %vm1031_vm2, %v1246_v31  ;;  %v1215_v44 = vpack.c.bf16 %v728_v32, %v728_v32  ;;  %v532_v46 = vmul.f32 %v1620_v34, %v1801_v52  ;;  %v564_v47 = vmul.f32 %v1620_v34, %v1803_v53 }
 0x111   :  { %v1247_v45 = vpack.c.bf16 %v760_v33, %v760_v33  ;;  %1051 = vst.msk [vmem:[%s2081_s4 + $0x4c] sm:$0xf] %vm1031_vm2, %v1217_v38  ;;  %1083 = vst.msk [vmem:[%s2081_s4 + $0xcc] sm:$0xf] %vm1031_vm2, %v1249_v39  ;;  %v605_v48 = vadd.f32 %v1625_v36, %v534_v40  ;;  %v637_v49 = vadd.f32 %v1625_v36, %v566_v41  ;;  %v1917_v2 = vpop.f32.mrb[28].mxu0 }
 0x112   :  { %v535_v50 = vmul.f32 %v1815_v58, %v1620_v34  ;;  %v567_v51 = vmul.f32 %v1817_v59, %v1620_v34  ;;  %1049 = vst.msk [vmem:[%s2081_s4 + $0x44] sm:$0xf] %vm1031_vm2, %v1215_v44  ;;  %v603_v52 = vadd.f32 %v1625_v36, %v532_v46  ;;  %v635_v53 = vadd.f32 %v1625_v36, %v564_v47  ;;  %v1919_v3 = vpop.f32.mrb[28].mxu1  ;;  %v1921_v6 = vpop.f32.mrb[29].mxu0 }
 0x113   :  { %1081 = vst.msk [vmem:[%s2081_s4 + $0xc4] sm:$0xf] %vm1031_vm2, %v1247_v45  ;;  %v533_v54 = vmul.f32 %v1620_v34, %v333_v0  ;;  %v565_v55 = vmul.f32 %v1620_v34, %v461_v1  ;;  %v669_v56 = vmax.f32 %v605_v48, 0.0  ;;  %v701_v57 = vmax.f32 %v637_v49, 0.0  ;;  %v1923_v7 = vpop.f32.mrb[29].mxu1  ;;  %v1925_v12 = vpop.f32.mrb[30].mxu0 }
 0x114   :  { %v606_v58 = vadd.f32 %v1625_v36, %v535_v50  ;;  %v638_v59 = vadd.f32 %v1625_v36, %v567_v51  ;;  %v667_v60 = vmax.f32 %v603_v52, 0.0  ;;  %v699_v61 = vmax.f32 %v635_v53, 0.0  ;;  %v1927_v13 = vpop.f32.mrb[30].mxu1  ;;  %v1929_v18 = vpop.f32.mrb[31].mxu0 }
 0x115   :  { %v604_v62 = vadd.f32 %v1625_v36, %v533_v54  ;;  %v636_v63 = vadd.f32 %v1625_v36, %v565_v55  ;;  %v733_v4 = vmin.f32 %v669_v56, 6.0  ;;  %v765_v0 = vmin.f32 %v701_v57, 6.0  ;;  %v1931_v19 = vpop.f32.mrb[31].mxu1 }
 0x116   :  { %v670_v5 = vmax.f32 %v606_v58, 0.0  ;;  %v702_v1 = vmax.f32 %v638_v59, 0.0  ;;  %v731_v8 = vmin.f32 %v667_v60, 6.0  ;;  %v763_v9 = vmin.f32 %v699_v61, 6.0 }
 0x117   :  { %v668_v10 = vmax.f32 %v604_v62, 0.0  ;;  %v700_v11 = vmax.f32 %v636_v63, 0.0  ;;  %v1220_v14 = vpack.c.bf16 %v733_v4, %v733_v4  ;;  %v1252_v15 = vpack.c.bf16 %v765_v0, %v765_v0 }
 0x118   :  { %v734_v16 = vmin.f32 %v670_v5, 6.0  ;;  %v766_v17 = vmin.f32 %v702_v1, 6.0  ;;  %v1218_v20 = vpack.c.bf16 %v731_v8, %v731_v8  ;;  %v1250_v21 = vpack.c.bf16 %v763_v9, %v763_v9 }
 0x119   :  { %v732_v24 = vmin.f32 %v668_v10, 6.0  ;;  %v764_v25 = vmin.f32 %v700_v11, 6.0  ;;  %1054 = vst.msk [vmem:[%s2081_s4 + $0x58] sm:$0xf] %vm1031_vm2, %v1220_v14  ;;  %1086 = vst.msk [vmem:[%s2081_s4 + $0xd8] sm:$0xf] %vm1031_vm2, %v1252_v15  ;;  %v538_v30 = vmul.f32 %v1847_v22, %v1620_v34  ;;  %v570_v31 = vmul.f32 %v1849_v23, %v1620_v34 }
 0x11a   :  { %v1221_v26 = vpack.c.bf16 %v734_v16, %v734_v16  ;;  %v1253_v27 = vpack.c.bf16 %v766_v17, %v766_v17  ;;  %1052 = vst.msk [vmem:[%s2081_s4 + $0x50] sm:$0xf] %vm1031_vm2, %v1218_v20  ;;  %1084 = vst.msk [vmem:[%s2081_s4 + $0xd0] sm:$0xf] %vm1031_vm2, %v1250_v21  ;;  %v536_v38 = vmul.f32 %v1620_v34, %v1851_v28 }
 0x11b   :  { %v1219_v32 = vpack.c.bf16 %v732_v24, %v732_v24  ;;  %v1251_v33 = vpack.c.bf16 %v764_v25, %v764_v25  ;;  %v568_v22 = vmul.f32 %v1620_v34, %v1853_v29  ;;  %v609_v23 = vadd.f32 %v1625_v36, %v538_v30 }
 0x11c   :  { %1055 = vst.msk [vmem:[%s2081_s4 + $0x5c] sm:$0xf] %vm1031_vm2, %v1221_v26  ;;  %1087 = vst.msk [vmem:[%s2081_s4 + $0xdc] sm:$0xf] %vm1031_vm2, %v1253_v27  ;;  %v641_v39 = vadd.f32 %v1625_v36, %v570_v31  ;;  %v539_v28 = vmul.f32 %v1855_v35, %v1620_v34  ;;  %v571_v29 = vmul.f32 %v1857_v37, %v1620_v34 }
 0x11d   :  { %1053 = vst.msk [vmem:[%s2081_s4 + $0x54] sm:$0xf] %vm1031_vm2, %v1219_v32  ;;  %1085 = vst.msk [vmem:[%s2081_s4 + $0xd4] sm:$0xf] %vm1031_vm2, %v1251_v33  ;;  %v607_v40 = vadd.f32 %v1625_v36, %v536_v38  ;;  %v639_v41 = vadd.f32 %v1625_v36, %v568_v22  ;;  %v537_v35 = vmul.f32 %v1620_v34, %v1871_v42  ;;  %v673_v44 = vmax.f32 %v609_v23, 0.0 }
 0x11e   :  { %v569_v37 = vmul.f32 %v1620_v34, %v1873_v43  ;;  %v705_v45 = vmax.f32 %v641_v39, 0.0  ;;  %v610_v46 = vadd.f32 %v1625_v36, %v539_v28  ;;  %v642_v47 = vadd.f32 %v1625_v36, %v571_v29 }
 0x11f   :  { %v671_v48 = vmax.f32 %v607_v40, 0.0  ;;  %v703_v49 = vmax.f32 %v639_v41, 0.0  ;;  %v608_v50 = vadd.f32 %v1625_v36, %v537_v35  ;;  %v737_v52 = vmin.f32 %v673_v44, 6.0 }
 0x120   :  { %v640_v51 = vadd.f32 %v1625_v36, %v569_v37  ;;  %v769_v53 = vmin.f32 %v705_v45, 6.0  ;;  %v674_v54 = vmax.f32 %v610_v46, 0.0  ;;  %v706_v55 = vmax.f32 %v642_v47, 0.0 }
 0x121   :  { %v735_v42 = vmin.f32 %v671_v48, 6.0  ;;  %v767_v56 = vmin.f32 %v703_v49, 6.0  ;;  %v672_v57 = vmax.f32 %v608_v50, 0.0  ;;  %v1224_v58 = vpack.c.bf16 %v737_v52, %v737_v52 }
 0x122   :  { %v704_v43 = vmax.f32 %v640_v51, 0.0  ;;  %v1256_v59 = vpack.c.bf16 %v769_v53, %v769_v53  ;;  %v738_v60 = vmin.f32 %v674_v54, 6.0  ;;  %v770_v61 = vmin.f32 %v706_v55, 6.0 }
 0x123   :  { %v1222_v62 = vpack.c.bf16 %v735_v42, %v735_v42  ;;  %v1254_v63 = vpack.c.bf16 %v767_v56, %v767_v56  ;;  %v736_v4 = vmin.f32 %v672_v57, 6.0  ;;  %1058 = vst.msk [vmem:[%s2081_s4 + $0x68] sm:$0xf] %vm1031_vm2, %v1224_v58  ;;  %v542_v8 = vmul.f32 %v1917_v2, %v1620_v34 }
 0x124   :  { %v768_v0 = vmin.f32 %v704_v43, 6.0  ;;  %1090 = vst.msk [vmem:[%s2081_s4 + $0xe8] sm:$0xf] %vm1031_vm2, %v1256_v59  ;;  %v1225_v5 = vpack.c.bf16 %v738_v60, %v738_v60  ;;  %v1257_v1 = vpack.c.bf16 %v770_v61, %v770_v61  ;;  %v574_v9 = vmul.f32 %v1919_v3, %v1620_v34 }
 0x125   :  { %1056 = vst.msk [vmem:[%s2081_s4 + $0x60] sm:$0xf] %vm1031_vm2, %v1222_v62  ;;  %1088 = vst.msk [vmem:[%s2081_s4 + $0xe0] sm:$0xf] %vm1031_vm2, %v1254_v63  ;;  %v1223_v10 = vpack.c.bf16 %v736_v4, %v736_v4  ;;  %v540_v14 = vmul.f32 %v1620_v34, %v1921_v6  ;;  %v572_v2 = vmul.f32 %v1620_v34, %v1923_v7 }
 0x126   :  { %v1255_v11 = vpack.c.bf16 %v768_v0, %v768_v0  ;;  %1059 = vst.msk [vmem:[%s2081_s4 + $0x6c] sm:$0xf] %vm1031_vm2, %v1225_v5  ;;  %1091 = vst.msk [vmem:[%s2081_s4 + $0xec] sm:$0xf] %vm1031_vm2, %v1257_v1  ;;  %v613_v3 = vadd.f32 %v1625_v36, %v542_v8  ;;  %v645_v15 = vadd.f32 %v1625_v36, %v574_v9 }
 0x127   :  { %v543_v6 = vmul.f32 %v1925_v12, %v1620_v34  ;;  %v575_v7 = vmul.f32 %v1927_v13, %v1620_v34  ;;  %1057 = vst.msk [vmem:[%s2081_s4 + $0x64] sm:$0xf] %vm1031_vm2, %v1223_v10  ;;  %v611_v16 = vadd.f32 %v1625_v36, %v540_v14  ;;  %v643_v17 = vadd.f32 %v1625_v36, %v572_v2 }
 0x128   :  { %1089 = vst.msk [vmem:[%s2081_s4 + $0xe4] sm:$0xf] %vm1031_vm2, %v1255_v11  ;;  %v541_v12 = vmul.f32 %v1620_v34, %v1929_v18  ;;  %v573_v13 = vmul.f32 %v1620_v34, %v1931_v19  ;;  %v677_v20 = vmax.f32 %v613_v3, 0.0  ;;  %v709_v21 = vmax.f32 %v645_v15, 0.0 }
 0x129   :  { %v614_v24 = vadd.f32 %v1625_v36, %v543_v6  ;;  %v646_v25 = vadd.f32 %v1625_v36, %v575_v7  ;;  %v675_v26 = vmax.f32 %v611_v16, 0.0  ;;  %v707_v27 = vmax.f32 %v643_v17, 0.0 }
 0x12a   :  { %v612_v30 = vadd.f32 %v1625_v36, %v541_v12  ;;  %v644_v31 = vadd.f32 %v1625_v36, %v573_v13  ;;  %v741_v32 = vmin.f32 %v677_v20, 6.0  ;;  %v773_v33 = vmin.f32 %v709_v21, 6.0 }
 0x12b   :  { %v678_v38 = vmax.f32 %v614_v24, 0.0  ;;  %v710_v22 = vmax.f32 %v646_v25, 0.0  ;;  %v739_v18 = vmin.f32 %v675_v26, 6.0  ;;  %v771_v23 = vmin.f32 %v707_v27, 6.0 }
 0x12c   :  { %v676_v39 = vmax.f32 %v612_v30, 0.0  ;;  %v708_v34 = vmax.f32 %v644_v31, 0.0  ;;  %v1228_v19 = vpack.c.bf16 %v741_v32, %v741_v32  ;;  %v1260_v28 = vpack.c.bf16 %v773_v33, %v773_v33 }
 0x12d   :  { %v742_v29 = vmin.f32 %v678_v38, 6.0  ;;  %v774_v40 = vmin.f32 %v710_v22, 6.0  ;;  %v1226_v41 = vpack.c.bf16 %v739_v18, %v739_v18  ;;  %v1258_v35 = vpack.c.bf16 %v771_v23, %v771_v23 }
 0x12e   :  { %v740_v37 = vmin.f32 %v676_v39, 6.0  ;;  %v772_v44 = vmin.f32 %v708_v34, 6.0  ;;  %1062 = vst.msk [vmem:[%s2081_s4 + $0x78] sm:$0xf] %vm1031_vm2, %v1228_v19  ;;  %1094 = vst.msk [vmem:[%s2081_s4 + $0xf8] sm:$0xf] %vm1031_vm2, %v1260_v28 }
 0x12f   :  { %v1229_v36 = vpack.c.bf16 %v742_v29, %v742_v29  ;;  %v1261_v45 = vpack.c.bf16 %v774_v40, %v774_v40  ;;  %1060 = vst.msk [vmem:[%s2081_s4 + $0x70] sm:$0xf] %vm1031_vm2, %v1226_v41  ;;  %1092 = vst.msk [vmem:[%s2081_s4 + $0xf0] sm:$0xf] %vm1031_vm2, %v1258_v35 }
 0x130   :  { %v1227_v46 = vpack.c.bf16 %v740_v37, %v740_v37  ;;  %v1259_v47 = vpack.c.bf16 %v772_v44, %v772_v44 }
 0x131   :  { %1063 = vst.msk [vmem:[%s2081_s4 + $0x7c] sm:$0xf] %vm1031_vm2, %v1229_v36  ;;  %1095 = vst.msk [vmem:[%s2081_s4 + $0xfc] sm:$0xf] %vm1031_vm2, %v1261_v45 }
 0x132   :  { %1061 = vst.msk [vmem:[%s2081_s4 + $0x74] sm:$0xf] %vm1031_vm2, %v1227_v46  ;;  %1093 = vst.msk [vmem:[%s2081_s4 + $0xf4] sm:$0xf] %vm1031_vm2, %v1259_v47 }

</bundles_post_ra>
